<compile_context>
chip_gen: v6e
topology: v6e:2x2x1
jax: 0.10.0
libtpu: 0.0.40
codegen_flags: <defaults>
</compile_context>

<pallas_src>
from itertools import combinations

import jax
import jax.numpy as jnp
from jax.experimental import pallas as pl
from jax.experimental.pallas import tpu as pltpu


def bilinear_kernel(x_ref, w_ref, xr_ref, o_ref):
    # x_ref:  (block_b, F*D)  flattened embeddings for this batch tile
    # w_ref:  (F*D, P*D)      block-sparse weights (VMEM-resident across the grid)
    # xr_ref: (block_b, P*D)  j-side embeddings, pair-major along the lane axis
    # o_ref:  (block_b, P*D)  lane-dense output slab
    y = jnp.dot(x_ref[...], w_ref[...], preferred_element_type=jnp.float32)
    o_ref[...] = (y * xr_ref[...]).astype(o_ref.dtype)


def build_block_sparse_weights(weights, num_fields, pairs):
    """[P, D, D] per-pair Linear weights -> [F*D, P*D] block-sparse matrix.

    Column block p holds W_p^T at row block i_p so that
    x.reshape(B, F*D) @ Wbig, in column block p, equals feature_emb[:, i_p] @ W_p^T.
    (Parameter-only; in a real model this is precomputed once, not per forward.)
    """
    P, D, _ = weights.shape
    F = num_fields
    i_idx = jnp.array([p[0] for p in pairs], dtype=jnp.int32)
    left_onehot = (
        jnp.zeros((F, P), weights.dtype).at[i_idx, jnp.arange(P)].set(1.0)
    )
    wt = jnp.transpose(weights, (0, 2, 1))                    # W_p^T, [P, D, D]
    wbig = jnp.einsum("fp,pde->fdpe", left_onehot, wt)        # [F, D, P, D]
    return wbig.reshape(F * D, P * D)


def bilinear_interaction(feature_emb, weights, *, block_b=None):
    """feature_emb: [B, F, D] float32
       weights:     [P, D, D] float32, PyTorch nn.Linear convention (y = x @ W^T)
       returns:     [B, P, D] float32
    """
    B, F, D = feature_emb.shape
    pairs = list(combinations(range(F), 2))
    P = len(pairs)
    assert weights.shape == (P, D, D)

    # Tile the batch axis only when it is large; for small B a single block is used.
    if block_b is None:
        block_b = 1024 if (B % 1024 == 0) else B
    assert B % block_b == 0

    # Wrapper glue (cheap / parameter-only):
    x2d = feature_emb.reshape(B, F * D)                       # free reshape
    j_idx = jnp.array([p[1] for p in pairs], dtype=jnp.int32)
    right2d = feature_emb[:, j_idx, :].reshape(B, P * D)      # j-side gather, once
    wbig = build_block_sparse_weights(weights, F, pairs)      # [F*D, P*D]

    out2d = pl.pallas_call(
        bilinear_kernel,
        out_shape=jax.ShapeDtypeStruct((B, P * D), feature_emb.dtype),
        grid=(B // block_b,),
        in_specs=[
            pl.BlockSpec((block_b, F * D), lambda b: (b, 0)),
            pl.BlockSpec((F * D, P * D), lambda b: (0, 0)),   # weights stay resident
            pl.BlockSpec((block_b, P * D), lambda b: (b, 0)),
        ],
        out_specs=pl.BlockSpec((block_b, P * D), lambda b: (b, 0)),
        compiler_params=pltpu.CompilerParams(
            dimension_semantics=("parallel",)),
    )(x2d, wbig, right2d)

    return out2d.reshape(B, P, D)                             # free reshape


def reference_bilinear_interaction(feature_emb, weights):
    """Pure-JAX reference mirroring the PyTorch forward."""
    B, F, D = feature_emb.shape
    pairs = list(combinations(range(F), 2))
    outs = []
    for p, (i, j) in enumerate(pairs):
        vi = feature_emb[:, i, :]                             # [B, D]
        vj = feature_emb[:, j, :]                             # [B, D]
        outs.append((vi @ weights[p].T) * vj)                 # [B, D]
    return jnp.stack(outs, axis=1)                            # [B, P, D]


if __name__ == "__main__":
    # Small shapes consistent with the module: batch=2, num_fields=4, d_embed=32
    B, F, D = 2, 4, 32
    P = F * (F - 1) // 2

    key = jax.random.PRNGKey(0)
    k_emb, k_w = jax.random.split(key)
    feature_emb = jax.random.normal(k_emb, (B, F, D), dtype=jnp.float32)
    # Deterministic per-pair Linear weights (PyTorch-like uniform init scale).
    bound = 1.0 / (D ** 0.5)
    weights = jax.random.uniform(k_w, (P, D, D), dtype=jnp.float32,
                                 minval=-bound, maxval=bound)

    out = bilinear_interaction(feature_emb, weights)
    out = jax.block_until_ready(out)

    ref = reference_bilinear_interaction(feature_emb, weights)
    assert out.shape == (B, P, D)
    assert jnp.allclose(out, ref, atol=1e-5, rtol=1e-5), "mismatch vs reference"

    print("KERNEL_OK")
</pallas_src>

<mosaic_0001>
module attributes {stable_mosaic.version = 11 : i64} {
  func.func @bilinear_kernel(%arg0: i32, %arg1: memref<2x128xf32, #tpu.memory_space<vmem>>, %arg2: memref<128x192xf32, #tpu.memory_space<vmem>>, %arg3: memref<2x192xf32, #tpu.memory_space<vmem>>, %arg4: memref<2x192xf32, #tpu.memory_space<vmem>>) attributes {dimension_semantics = [#tpu.dimension_semantics<parallel>], iteration_bounds = array<i64: 1>, scalar_prefetch = 0 : i64, scratch_operands = 0 : i64, tpu.core_type = #tpu.core_type<tc>, window_params = [{transform_indices = @transform_0, window_bounds = array<i64: 2, 128>}, {pipeline_mode = #tpu.pipeline_mode<synchronous>, transform_indices = @transform_1, window_bounds = array<i64: 128, 192>}, {transform_indices = @transform_2, window_bounds = array<i64: 2, 192>}, {transform_indices = @transform_3, window_bounds = array<i64: 2, 192>}]} {
    %c0 = arith.constant 0 : index
    %c0_0 = arith.constant 0 : index
    %0 = vector.load %arg1[%c0, %c0_0] : memref<2x128xf32, #tpu.memory_space<vmem>>, vector<2x128xf32>
    %c0_1 = arith.constant 0 : index
    %c0_2 = arith.constant 0 : index
    %1 = vector.load %arg2[%c0_1, %c0_2] : memref<128x192xf32, #tpu.memory_space<vmem>>, vector<128x192xf32>
    %cst = arith.constant dense<0.000000e+00> : vector<2x192xf32>
    %2 = tpu.matmul %0, %1, %cst {dimension_numbers = #tpu.dot_dimension_numbers<[1], [0], [0], [1], [0, 0, 1, 1], [], []>} : vector<2x128xf32>, vector<128x192xf32>, vector<2x192xf32> -> vector<2x192xf32>
    %c0_3 = arith.constant 0 : index
    %c0_4 = arith.constant 0 : index
    %3 = vector.load %arg3[%c0_3, %c0_4] : memref<2x192xf32, #tpu.memory_space<vmem>>, vector<2x192xf32>
    %4 = arith.mulf %2, %3 : vector<2x192xf32>
    %c0_5 = arith.constant 0 : index
    %c0_6 = arith.constant 0 : index
    %5 = vector.load %arg4[%c0_5, %c0_6] : memref<2x192xf32, #tpu.memory_space<vmem>>, vector<2x192xf32>
    tpu.vector_store %arg4[%c0_5, %c0_6], %4 {strides = array<i32>} : memref<2x192xf32, #tpu.memory_space<vmem>>, vector<2x192xf32>,
    return
  }
  func.func @transform_0(%arg0: i32) -> (i32, i32) {
    %c0_i32 = arith.constant 0 : i32
    %c0_i32_0 = arith.constant 0 : i32
    return %arg0, %c0_i32 : i32, i32
  }
  func.func @transform_1(%arg0: i32) -> (i32, i32) {
    %c0_i32 = arith.constant 0 : i32
    %c0_i32_0 = arith.constant 0 : i32
    %c0_i32_1 = arith.constant 0 : i32
    return %c0_i32, %c0_i32_0 : i32, i32
  }
  func.func @transform_2(%arg0: i32) -> (i32, i32) {
    %c0_i32 = arith.constant 0 : i32
    %c0_i32_0 = arith.constant 0 : i32
    return %arg0, %c0_i32 : i32, i32
  }
  func.func @transform_3(%arg0: i32) -> (i32, i32) {
    %c0_i32 = arith.constant 0 : i32
    %c0_i32_0 = arith.constant 0 : i32
    return %arg0, %c0_i32 : i32, i32
  }
}

</mosaic_0001>

<bundles_post_ra>
// kernel: tpu_custom_call.1
= control target key start
LH: loop header
LB: loop body
LE: loop exit
PB: predicated region body
PF: predicated region fallthrough
CT: control target
= control target key end

     0   :  { %v188_v4 = vmov 0.0   ;;  %s316_s0 = inlined_call_operand.vmem [shape: f32[2,128], index: 0, kind: input, shape index: {}]   ;;  %s317_s1 = inlined_call_operand.vmem [shape: f32[128,192], index: 1, kind: input, shape index: {}]   ;;  %s318_s2 = inlined_call_operand.vmem [shape: f32[2,192], index: 2, kind: input, shape index: {}]   ;;  %s319_s3 = inlined_call_operand.hbm [shape: f32[2,192], index: 3, kind: output, shape index: {}]  }
   0x1   :  { %v47_v0 = vld [vmem:[%s317_s1 + $0xf8] sm:$0xff]  ;;  %v46_v1 = vld [vmem:[%s317_s1 + $0xf0] sm:$0xff]  ;;  %v45_v2 = vld [vmem:[%s317_s1 + $0xe8] sm:$0xff]  ;;  %112 = vmatprep.mubr.f32.mxu0 %v188_v4 }
   0x2   :  { %48 = vmatprep.subr.mxu0 %v47_v0  ;;  %v44_v3 = vld [vmem:[%s317_s1 + $0xe0] sm:$0xff]  ;;  %v43_v5 = vld [vmem:[%s317_s1 + $0xd8] sm:$0xff]  ;;  %v42_v6 = vld [vmem:[%s317_s1 + $0xd0] sm:$0xff] }
   0x3   :  { %49 = vmatpush1.msra.mxu0 %v46_v1  ;;  %v41_v7 = vld [vmem:[%s317_s1 + $0xc8] sm:$0xff]  ;;  %v40_v8 = vld [vmem:[%s317_s1 + $0xc0] sm:$0xff]  ;;  %v39_v9 = vld [vmem:[%s317_s1 + $0xb8] sm:$0xff] }
   0x4   :  { %50 = vmatprep.subr.mxu0 %v45_v2  ;;  %v38_v10 = vld [vmem:[%s317_s1 + $0xb0] sm:$0xff]  ;;  %v37_v11 = vld [vmem:[%s317_s1 + $0xa8] sm:$0xff]  ;;  %v36_v12 = vld [vmem:[%s317_s1 + $0xa0] sm:$0xff] }
   0x5   :  { %51 = vmatpush1.msra.mxu0 %v44_v3  ;;  %v35_v13 = vld [vmem:[%s317_s1 + $0x98] sm:$0xff]  ;;  %v34_v14 = vld [vmem:[%s317_s1 + $0x90] sm:$0xff] }
   0x6   :  { %52 = vmatprep.subr.mxu0 %v43_v5 }
   0x7   :  { %53 = vmatpush1.msra.mxu0 %v42_v6 }
   0x8   :  { %54 = vmatprep.subr.mxu0 %v41_v7 }
   0x9   :  { %55 = vmatpush1.msra.mxu0 %v40_v8 }
   0xa   :  { %56 = vmatprep.subr.mxu0 %v39_v9 }
   0xb   :  { %57 = vmatpush1.msra.mxu0 %v38_v10 }
   0xc   :  { %58 = vmatprep.subr.mxu0 %v37_v11 }
   0xd   :  { %8 = vsyncpa [#allocation3], 0  ;;  %59 = vmatpush1.msra.mxu0 %v36_v12  ;;  %v33_v15 = vld [vmem:[%s317_s1 + $0x88] sm:$0xff]  ;;  %v32_v16 = vld [vmem:[%s317_s1 + $0x80] sm:$0xff]  ;;  %v189_v34 = vmov 1983009808   ;;  %v139_v36 = vlaneseq }
   0xe   :  { %60 = vmatprep.subr.mxu0 %v35_v13  ;;  %v31_v17 = vld [vmem:[%s317_s1 + $0x78] sm:$0xff]  ;;  %v30_v18 = vld [vmem:[%s317_s1 + $0x70] sm:$0xff]  ;;  %v29_v19 = vld [vmem:[%s317_s1 + $0x68] sm:$0xff]  ;;  %v137_v35 = vunpack.c.l.s4 %v189_v34  ;;  %vm144_vm0 = vcmask 1041408   ;;  %vm145_vm1 = vcmask 519170  }
   0xf   :  { %61 = vmatpush1.msra.mxu0 %v34_v14  ;;  %v28_v20 = vld [vmem:[%s317_s1 + $0x60] sm:$0xff]  ;;  %v27_v21 = vld [vmem:[%s317_s1 + $0x58] sm:$0xff]  ;;  %v26_v22 = vld [vmem:[%s317_s1 + $0x50] sm:$0xff]  ;;  %v140_v39 = vshrl.u32 %v139_v36, 7 }
  0x10   :  { %62 = vmatprep.subr.mxu0 %v33_v15  ;;  %v25_v23 = vld [vmem:[%s317_s1 + $0x48] sm:$0xff]  ;;  %v24_v24 = vld [vmem:[%s317_s1 + $0x40] sm:$0xff]  ;;  %v23_v25 = vld [vmem:[%s317_s1 + $0x38] sm:$0xff]  ;;  %v138_v38 = vunpack.c.0.s8 %v137_v35 }
  0x11   :  { %63 = vmatpush1.msra.mxu0 %v32_v16  ;;  %v22_v26 = vld [vmem:[%s317_s1 + $0x30] sm:$0xff]  ;;  %v21_v27 = vld [vmem:[%s317_s1 + $0x28] sm:$0xff]  ;;  %v20_v28 = vld [vmem:[%s317_s1 + $0x20] sm:$0xff] }
  0x12   :  { %64 = vmatprep.subr.mxu0 %v31_v17  ;;  %v19_v29 = vld [vmem:[%s317_s1 + $0x18] sm:$0xff]  ;;  %v18_v30 = vld [vmem:[%s317_s1 + $0x10] sm:$0xff]  ;;  %v17_v31 = vld [vmem:[%s317_s1 + $0x8] sm:$0xff]  ;;  %v141_v43 = vsub.s32 %v138_v38, %v140_v39 }
  0x13   :  { %65 = vmatpush1.msra.mxu0 %v30_v18  ;;  %v16_v32 = vld [vmem:[%s317_s1] sm:$0xff]  ;;  %vm146_vm2 = vmor %vm145_vm1, %vm144_vm0 }
  0x14   :  { %66 = vmatprep.subr.mxu0 %v29_v19  ;;  %v15_v33 = vld [vmem:[%s316_s0] sm:$0x3]  ;;  %s190_s0 = smov [#allocation2]  }
  0x15   :  { %67 = vmatpush1.msra.mxu0 %v28_v20  ;;  %v162_v37 = vld.sshfl [vmem:[%s318_s2] sm:$0x33 pattern:$0x76325410]  ;;  %s154_s1 = sshll.u32 %s190_s0, 4  ;;  %s155_s1 = int_to_ptr.vmem [resolvable:$true] %s154_s1 }
  0x16   :  { %68 = vmatprep.subr.mxu0 %v27_v21  ;;  %v128_v40 = vcombine.high %v162_v37, %v162_v37  ;;  %s166_s26 = scalar_lea.vmem %s155_s1, 64  ;;  %p171_p1 = scmp.lt.s32.totalorder %s155_s1, %s155_s1 }
  0x17   :  { %69 = vmatpush1.msra.mxu0 %v26_v22  ;;  %p167_p0 = scmp.ne.s32.totalorder %s155_s1, %s166_s26  ;;  %p172_p2 = scmp.lt.s32.totalorder %s166_s26, %s166_s26 }
  0x18   :  { %70 = vmatprep.subr.mxu0 %v25_v23 }
  0x19   :  { %71 = vmatpush1.msra.mxu0 %v24_v24  ;;  %p173_p3 = por %p172_p2, %p171_p1 }
  0x1a   :  { %72 = vmatprep.subr.mxu0 %v23_v25 }
  0x1b   :  { %73 = vmatpush1.msra.mxu0 %v22_v26  ;;  %p174_p4 = pnand %p173_p3, %p167_p0 }
  0x1c   :  { %74 = vmatprep.subr.mxu0 %v21_v27 }
  0x1d   :  { %75 = vmatpush1.msra.mxu0 %v20_v28 }
  0x1e   :  { %76 = vmatprep.subr.mxu0 %v19_v29 }
  0x1f   :  { %77 = vmatpush1.msra.mxu0 %v18_v30 }
  0x20   :  { %78 = vmatprep.subr.mxu0 %v17_v31 }
  0x21   :  { %79 = vmatpush1.msra.mxu0 %v16_v32 }
  0x22   :  { %113 = vmatmul.mubr.f32.vlgmr.msra.gmra.mxu0 %v15_v33 }
  0xe2   :  { %v114_v41 = vpop.f32.mrf.mxu0 }
  0xe3   :  { %v131_v44 = vmul.f32 %v162_v37, %v114_v41 }
  0xe4   :  { %v116_v42 = vpop.f32.mrf.mxu0 }
  0xe5   :  { %v132_v45 = vmul.f32 %v128_v40, %v116_v42 }
  0xe7   :  { %v135_v46 = vcombine.low %v131_v44, %v132_v45 }
  0xe9   :  { %v142_v47 = vrot.slane %v135_v46, %v141_v43 }
  0xeb   :  { %147 = vst.msk [vmem:[#allocation2] sm:$0xf] %vm146_vm2, %v142_v47 }
  0xec   :  { %177 = shalt.err (!%p174_p4)
}
  0xed   :  { %157 = dma.vmem_to_hbm [thread:$0]  %s155_s1, 64, %s319_s3, [#allocation3]  }
  0xee   :  { %186 = dma.done.wait [#allocation3], 64  }
  0xef   :  { %187 = vsyncadd [#allocation3], 4294967232 }
  0xf0   :  { %161 = vsyncpa [#allocation3], 1 }

</bundles_post_ra>
